<compile_context>
chip_gen: v7x
topology: tpu7x:2x2x1
jax: 0.10.0
libtpu: 0.0.40
codegen_flags: <defaults>
</compile_context>

<pallas_src>
import functools

import jax
import jax.numpy as jnp
from jax.experimental import pallas as pl
from jax.experimental.pallas import tpu as pltpu

_VMEM_LIMIT = 64 * 1024 * 1024


def _round_up(x, m):
    return ((x + m - 1) // m) * m


def _pick_tile(dim, desired, align):
    """Largest tile <= desired that divides dim (multiple of `align`); if dim is
    not `align`-aligned, fall back to the full dim (full-dim blocks are legal)."""
    if dim % align != 0:
        return dim
    t = max(align, (min(desired, dim) // align) * align)
    while dim % t != 0:
        t -= align
    return t


# ----------------------------- tiled matmul -------------------------------- #
def _matmul_kernel(x_ref, w_ref, o_ref, acc_ref):
    @pl.when(pl.program_id(2) == 0)
    def _():
        acc_ref[...] = jnp.zeros_like(acc_ref)

    acc_ref[...] += jnp.dot(x_ref[...].astype(jnp.bfloat16), w_ref[...],
                            preferred_element_type=jnp.float32)

    @pl.when(pl.program_id(2) == pl.num_programs(2) - 1)
    def _():
        o_ref[...] = acc_ref[...].astype(o_ref.dtype)


def matmul(x, w_bf16, *, out_dtype=jnp.bfloat16, tm=512, tn=256, tk=512):
    """x:(M,K), w_bf16:(K,N) bf16 -> (M,N) out_dtype.  bf16 MXU operands, f32 acc."""
    M, K = x.shape
    Kw, N = w_bf16.shape
    assert K == Kw
    Mp = _round_up(M, 8)
    tm = _pick_tile(Mp, tm, 8)
    tn = _pick_tile(N, tn, 128)
    tk = _pick_tile(K, tk, 128)
    xp = x if Mp == M else jnp.pad(x, ((0, Mp - M), (0, 0)))

    out = pl.pallas_call(
        _matmul_kernel,
        grid=(Mp // tm, N // tn, K // tk),
        in_specs=[
            pl.BlockSpec((tm, tk), lambda i, j, k: (i, k)),
            pl.BlockSpec((tk, tn), lambda i, j, k: (k, j)),
        ],
        out_specs=pl.BlockSpec((tm, tn), lambda i, j, k: (i, j)),
        out_shape=jax.ShapeDtypeStruct((Mp, N), out_dtype),
        scratch_shapes=[pltpu.VMEM((tm, tn), jnp.float32)],
        compiler_params=pltpu.CompilerParams(
            dimension_semantics=("parallel", "parallel", "arbitrary"),
            vmem_limit_bytes=_VMEM_LIMIT),
    )(xp, w_bf16)
    return out if Mp == M else out[:M]


# ----------------- causal depthwise conv1d + SiLU kernel ------------------- #
def _conv_silu_kernel(x_ref, w_ref, b_ref, o_ref, *, d_conv, seqlen):
    tc = o_ref.shape[-1]
    acc = jnp.zeros((seqlen, tc), jnp.float32) + b_ref[...]
    for k in range(d_conv):
        acc = acc + x_ref[0, k:k + seqlen, :].astype(jnp.float32) * w_ref[k:k + 1, :]
    o_ref[0] = (acc * jax.nn.sigmoid(acc)).astype(o_ref.dtype)      # silu(conv(x))


def conv1d_silu(x_pad, w, b, seqlen, *, out_dtype=jnp.bfloat16):
    """Causal depthwise conv + SiLU.  x_pad: (b, seqlen+d_conv-1, conv_dim)."""
    batch, l_pad, conv_dim = x_pad.shape
    d_conv = w.shape[0]
    # lane-dense channel tile; whole (padded) sequence sits in one block.
    # TODO(synk): add (d_conv-1)-halo sequence tiling for very long sequences.
    tc = conv_dim
    for cand in (512, 256, 128):
        if conv_dim % cand == 0:
            tc = cand
            break
    while (tc > 128 and conv_dim % (tc // 2) == 0
           and l_pad * tc * x_pad.dtype.itemsize > (2 << 20)):
        tc //= 2

    kernel = functools.partial(_conv_silu_kernel, d_conv=d_conv, seqlen=seqlen)
    return pl.pallas_call(
        kernel,
        grid=(batch, conv_dim // tc),
        in_specs=[
            pl.BlockSpec((1, l_pad, tc), lambda i, j: (i, 0, j)),
            pl.BlockSpec((d_conv, tc), lambda i, j: (0, j)),
            pl.BlockSpec((1, tc), lambda i, j: (0, j)),
        ],
        out_specs=pl.BlockSpec((1, seqlen, tc), lambda i, j: (i, 0, j)),
        out_shape=jax.ShapeDtypeStruct((batch, seqlen, conv_dim), out_dtype),
        compiler_params=pltpu.CompilerParams(
            dimension_semantics=("parallel", "parallel"),
            vmem_limit_bytes=_VMEM_LIMIT),
    )(x_pad, w, b.reshape(1, conv_dim))


# ------------------------------- SSD kernel -------------------------------- #
def _ssd_kernel(x_ref, dt_ref, b_ref, c_ref, adD_ref, y_ref, state_ref,
                ydiag_scr, *, cl, hb, hp, ns):
    c_idx = pl.program_id(2)
    hdim = hb * hp

    # carried state lives directly in the (chunk-resident) output ref
    @pl.when(c_idx == 0)
    def _():
        state_ref[0, 0] = jnp.zeros((ns, hdim), jnp.float32)

    x = x_ref[0, 0].astype(jnp.float32)             # (cl, hdim) un-scaled x
    dt_raw = dt_ref[0, 0, 0].astype(jnp.float32)    # (cl, hb)   pre-softplus dt
    Bm = b_ref[0, 0]                                # (cl, ns)   bf16
    Cm = c_ref[0, 0]                                # (cl, ns)   bf16
    A_row = adD_ref[0, 0:1, :]                      # (1, hb)    f32
    dtb_row = adD_ref[0, 1:2, :]                    # (1, hb)
    D_row = adD_ref[0, 2:3, :]                      # (1, hb)

    # fused: dt = softplus(dt_raw + dt_bias)  (stable form), A*dt
    dt_lin = dt_raw + dtb_row                                            # (cl, hb)
    dt_lh = jnp.maximum(dt_lin, 0.0) + jnp.log(1.0 + jnp.exp(-jnp.abs(dt_lin)))
    Adt_lh = dt_lh * A_row                                               # (cl, hb) <= 0

    # causal masks (VPU iota + compare)
    ii = jax.lax.broadcasted_iota(jnp.int32, (cl, cl), 0)
    jj = jax.lax.broadcasted_iota(jnp.int32, (cl, cl), 1)
    tril = ii >= jj

    # inclusive cumsum of A*dt along the chunk, as one MXU matmul
    A_cs = jnp.dot(tril.astype(jnp.float32), Adt_lh,
                   preferred_element_type=jnp.float32)                   # (cl, hb)
    A_last = A_cs[cl - 1:cl, :]                                          # (1, hb)

    # head -> (head*headdim) column-expansion matrix (0/1), built in-kernel
    he = jax.lax.broadcasted_iota(jnp.int32, (hb, hdim), 0)
    ce = jax.lax.broadcasted_iota(jnp.int32, (hb, hdim), 1) // hp
    E = (he == ce).astype(jnp.float32)                                   # (hb, hdim)

    def expand(v):                 # (r, hb) -> (r, hdim): per-head scalar -> columns
        return jnp.dot(v, E, preferred_element_type=jnp.float32)

    dt_cols = expand(dt_lh)                           # (cl, hdim)
    acs_exp_cols = expand(jnp.exp(A_cs))              # (cl, hdim)  state_decay_out
    xdec_cols = expand(jnp.exp(A_last - A_cs))        # (cl, hdim)  decay_states (<=1)
    cdecay_cols = expand(jnp.exp(A_last))             # (1, hdim)   chunk decay
    D_cols = expand(D_row)                            # (1, hdim)

    xdt = x * dt_cols                                 # (cl, hdim)
    xdt_bf = xdt.astype(jnp.bfloat16)

    # C·Bᵀ shared across heads (B/C are broadcast over heads in Mamba2)
    CB = jax.lax.dot_general(Cm, Bm, (((1,), (1,)), ((), ())),
                             preferred_element_type=jnp.float32)         # (cl, cl)

    prev = state_ref[0, 0]                                               # (ns, hdim)

    # inter-chunk term, all heads in ONE lane-dense matmul, + fused D residual
    y = acs_exp_cols * jnp.dot(Cm, prev.astype(jnp.bfloat16),
                               preferred_element_type=jnp.float32)       # (cl, hdim)
    y = y + x * D_cols

    # intra-chunk (diagonal) term: per-head (cl,cl)x(cl,hp) matmul into scratch
    for h in range(hb):
        a_h = A_cs[:, h:h + 1]                                           # (cl, 1)
        seg = jnp.where(tril, a_h - a_h.T, -jnp.inf)                     # masked BEFORE exp
        G_h = (CB * jnp.exp(seg)).astype(jnp.bfloat16)
        ydiag_scr[:, h * hp:(h + 1) * hp] = jnp.dot(
            G_h, xdt_bf[:, h * hp:(h + 1) * hp],
            preferred_element_type=jnp.float32)

    # one lane-dense store for y
    y_ref[0, 0] = (y + ydiag_scr[...]).astype(y_ref.dtype)

    # state update, all heads in ONE matmul:
    #   S <- exp(A_total) * S + Bᵀ @ (x*dt * exp(A_total - A_cs))
    Z = (xdt * xdec_cols).astype(jnp.bfloat16)                           # (cl, hdim)
    cs = jax.lax.dot_general(Bm, Z, (((0,), (0,)), ((), ())),
                             preferred_element_type=jnp.float32)         # (ns, hdim)
    state_ref[0, 0] = cdecay_cols * prev + cs


def ssd_pallas(x, dt_raw, B, C, A, dt_bias, D, *,
               chunk_size, nheads, headdim, head_block=None):
    """Chunked SSD scan with fused dt-softplus / A*dt / x*dt / D-residual.

    x:      (b, l, nheads*headdim)  un-scaled (post-conv) x     [bf16]
    dt_raw: (b, l, nheads)          pre-softplus dt             [bf16]
    B, C:   (b, l, d_state)                                     [bf16]
    A, dt_bias, D: (nheads,)                                    [f32]
    returns y: (b, l, nheads*headdim) bf16,
            final_state: (b, nheads, headdim, d_state) f32
    """
    batch, seqlen, d_inner = x.shape
    nh, hp = nheads, headdim
    assert d_inner == nh * hp
    ns = B.shape[-1]
    cl = chunk_size
    assert seqlen % cl == 0
    nc = seqlen // cl

    # head-block selection: bound per-block x/y bytes and (when batch == 1)
    # try to expose >= 2 parallel grid iterations (v7x has 2 TensorCores).
    if head_block is None:
        budget = 2 << 20

        def _ok(d):
            return d == nh or (d * hp) % 128 == 0

        cands = [d for d in range(1, nh + 1) if nh % d == 0 and _ok(d)]
        fitting = [d for d in cands if cl * d * hp * x.dtype.itemsize <= budget]
        hb = max(fitting) if fitting else min(cands)
        if batch == 1 and hb == nh:
            smaller = [d for d in fitting if d < nh]
            if smaller:
                hb = max(smaller)
    else:
        hb = head_block
    assert nh % hb == 0 and (hb == nh or (hb * hp) % 128 == 0)
    n_hblk = nh // hb
    hdim = hb * hp

    # lane-dense x / B / C; single dt layout (reshape-only when n_hblk == 1)
    xc = x.reshape(batch, nc, cl, nh * hp)
    Bc = B.reshape(batch, nc, cl, ns)
    Cc = C.reshape(batch, nc, cl, ns)
    if n_hblk == 1:
        dtc = dt_raw.reshape(batch, nc, 1, cl, nh)
    else:
        dtc = dt_raw.reshape(batch, nc, cl, n_hblk, hb).transpose(0, 1, 3, 2, 4)
    # pack A / dt_bias / D into one small input: (n_hblk, 3, hb)
    adD = jnp.stack([A, dt_bias, D], axis=0).astype(jnp.float32)
    adD = adD.reshape(3, n_hblk, hb).transpose(1, 0, 2)

    kernel = functools.partial(_ssd_kernel, cl=cl, hb=hb, hp=hp, ns=ns)
    y, state = pl.pallas_call(
        kernel,
        grid=(batch, n_hblk, nc),
        in_specs=[
            pl.BlockSpec((1, 1, cl, hdim), lambda b, h, c: (b, c, 0, h)),
            pl.BlockSpec((1, 1, 1, cl, hb), lambda b, h, c: (b, c, h, 0, 0)),
            pl.BlockSpec((1, 1, cl, ns), lambda b, h, c: (b, c, 0, 0)),
            pl.BlockSpec((1, 1, cl, ns), lambda b, h, c: (b, c, 0, 0)),
            pl.BlockSpec((1, 3, hb), lambda b, h, c: (h, 0, 0)),
        ],
        out_specs=[
            pl.BlockSpec((1, 1, cl, hdim), lambda b, h, c: (b, c, 0, h)),
            pl.BlockSpec((1, 1, ns, hdim), lambda b, h, c: (b, h, 0, 0)),
        ],
        out_shape=(
            jax.ShapeDtypeStruct((batch, nc, cl, nh * hp), jnp.bfloat16),
            jax.ShapeDtypeStruct((batch, n_hblk, ns, hdim), jnp.float32),
        ),
        scratch_shapes=[pltpu.VMEM((cl, hdim), jnp.float32)],
        compiler_params=pltpu.CompilerParams(
            dimension_semantics=("parallel", "parallel", "arbitrary"),
            vmem_limit_bytes=_VMEM_LIMIT),
    )(xc, dtc, Bc, Cc, adD)

    y = y.reshape(batch, seqlen, nh * hp)
    # (b, n_hblk, ns, hb*hp) -> (b, nh, hp, ns)
    state = state.reshape(batch, n_hblk, ns, hb, hp)
    state = jnp.transpose(state, (0, 1, 3, 4, 2)).reshape(batch, nh, hp, ns)
    return y, state


# ------------------ fused gated RMSNorm + out_proj kernel ------------------- #
def _norm_outproj_kernel(y_ref, z_ref, nw_ref, w_ref, o_ref, g_scr, *, eps):
    # normalize + gate once per row tile; reuse across output-column tiles
    @pl.when(pl.program_id(1) == 0)
    def _():
        z = z_ref[...].astype(jnp.float32)
        g = y_ref[...].astype(jnp.float32) * (z * jax.nn.sigmoid(z))     # y * silu(z)
        var = jnp.mean(g * g, axis=-1, keepdims=True)
        g_scr[...] = (g * jax.lax.rsqrt(var + eps) * nw_ref[...]).astype(g_scr.dtype)

    o_ref[...] = jnp.dot(g_scr[...], w_ref[...],
                         preferred_element_type=jnp.float32).astype(o_ref.dtype)


def norm_outproj(y, z, norm_w, w_out_bf16, *, eps=1e-5, tm=128, tn=256):
    b, l, d_inner = y.shape
    rows = b * l
    N = w_out_bf16.shape[1]
    Mp = _round_up(rows, 8)
    tm = _pick_tile(Mp, tm, 8)
    tn = _pick_tile(N, tn, 128)
    y2 = y.reshape(rows, d_inner)
    z2 = z.reshape(rows, d_inner)
    if Mp != rows:
        y2 = jnp.pad(y2, ((0, Mp - rows), (0, 0)))
        z2 = jnp.pad(z2, ((0, Mp - rows), (0, 0)))

    out = pl.pallas_call(
        functools.partial(_norm_outproj_kernel, eps=eps),
        grid=(Mp // tm, N // tn),
        in_specs=[
            pl.BlockSpec((tm, d_inner), lambda i, j: (i, 0)),
            pl.BlockSpec((tm, d_inner), lambda i, j: (i, 0)),
            pl.BlockSpec((1, d_inner), lambda i, j: (0, 0)),
            pl.BlockSpec((d_inner, tn), lambda i, j: (0, j)),
        ],
        out_specs=pl.BlockSpec((tm, tn), lambda i, j: (i, j)),
        out_shape=jax.ShapeDtypeStruct((Mp, N), jnp.float32),
        scratch_shapes=[pltpu.VMEM((tm, d_inner), jnp.bfloat16)],
        compiler_params=pltpu.CompilerParams(
            dimension_semantics=("parallel", "arbitrary"),
            vmem_limit_bytes=_VMEM_LIMIT),
    )(y2, z2, norm_w.reshape(1, d_inner).astype(jnp.float32), w_out_bf16)
    return out[:rows].reshape(b, l, N)


# ------------------------------ full forward ------------------------------- #
def mamba2_forward(u, params, *, d_inner, d_state, nheads, headdim, d_conv,
                   chunk_size):
    batch, seqlen, d_model = u.shape
    conv_dim = d_inner + 2 * d_state

    # weights in bf16 (in a real model these would be stored pre-cast)
    W_in = params["W_in"].astype(jnp.bfloat16)
    W_out = params["W_out"].astype(jnp.bfloat16)

    # in_proj (tiled bf16 MXU matmul, bf16 intermediates between stages)
    zxbcdt = matmul(u.reshape(batch * seqlen, d_model), W_in,
                    out_dtype=jnp.bfloat16)
    zxbcdt = zxbcdt.reshape(batch, seqlen, -1)
    z = zxbcdt[..., :d_inner]
    xBC = zxbcdt[..., d_inner:d_inner + conv_dim]
    dt_raw = zxbcdt[..., d_inner + conv_dim:]          # pre-softplus (b,l,nh)

    # conv_state cache: last d_conv pre-conv timesteps, (b, conv_dim, d_conv)
    if seqlen >= d_conv:
        tail = xBC[:, seqlen - d_conv:, :]
    else:
        tail = jnp.pad(xBC, ((0, 0), (d_conv - seqlen, 0), (0, 0)))
    conv_state = jnp.swapaxes(tail, 1, 2).astype(jnp.float32)

    # causal depthwise conv + SiLU (Pallas)
    xBC_pad = jnp.pad(xBC, ((0, 0), (d_conv - 1, 0), (0, 0)))
    xBC = conv1d_silu(xBC_pad, params["conv_w"], params["conv_b"], seqlen)

    x = xBC[..., :d_inner]
    B = xBC[..., d_inner:d_inner + d_state]
    C = xBC[..., d_inner + d_state:]

    A = -jnp.exp(params["A_log"])                      # (nheads,)

    # SSD core (Pallas); dt-softplus, x*dt, A*dt and D residual fused inside
    y, ssm_state = ssd_pallas(
        x, dt_raw, B, C, A, params["dt_bias"], params["D"],
        chunk_size=chunk_size, nheads=nheads, headdim=headdim)

    # gated RMSNorm fused with out_proj (Pallas)
    y = norm_outproj(y, z, params["norm_w"], W_out)
    return y, (conv_state, ssm_state)


# ---------------------------------- main ----------------------------------- #
if __name__ == "__main__":
    # small Mamba2 config (chunk_size should be 128-256 for real runs)
    d_model = 32
    expand = 2
    headdim = 16
    d_state = 16
    d_conv = 4
    chunk_size = 8
    d_inner = expand * d_model            # 64
    nheads = d_inner // headdim           # 4
    batch, seqlen = 2, 16
    d_in_proj = 2 * d_inner + 2 * d_state + nheads   # 164
    conv_dim = d_inner + 2 * d_state                  # 96

    key = jax.random.PRNGKey(0)
    ks = jax.random.split(key, 6)
    params = dict(
        W_in=0.05 * jax.random.normal(ks[0], (d_model, d_in_proj), jnp.float32),
        conv_w=0.2 * jax.random.normal(ks[1], (d_conv, conv_dim), jnp.float32),
        conv_b=0.1 * jax.random.normal(ks[2], (conv_dim,), jnp.float32),
        dt_bias=0.1 * jax.random.normal(ks[3], (nheads,), jnp.float32),
        A_log=jnp.log(jnp.arange(1, nheads + 1, dtype=jnp.float32)),
        D=jnp.ones((nheads,), jnp.float32),
        norm_w=jnp.ones((d_inner,), jnp.float32),
        W_out=0.05 * jax.random.normal(ks[4], (d_inner, d_model), jnp.float32),
    )
    u = jax.random.normal(ks[5], (batch, seqlen, d_model), jnp.float32)

    y, (conv_state, ssm_state) = mamba2_forward(
        u, params, d_inner=d_inner, d_state=d_state, nheads=nheads,
        headdim=headdim, d_conv=d_conv, chunk_size=chunk_size)
    jax.block_until_ready((y, conv_state, ssm_state))

    assert y.shape == (batch, seqlen, d_model)
    assert conv_state.shape == (batch, conv_dim, d_conv)
    assert ssm_state.shape == (batch, nheads, headdim, d_state)
    assert bool(jnp.isfinite(y).all())
    print("KERNEL_OK")
</pallas_src>

<mosaic_0001>
module attributes {stable_mosaic.version = 11 : i64} {
  func.func @_matmul_kernel(%arg0: i32, %arg1: i32, %arg2: i32, %arg3: memref<32x32xf32, #tpu.memory_space<vmem>>, %arg4: memref<32x164xbf16, #tpu.memory_space<vmem>>, %arg5: memref<32x164xbf16, #tpu.memory_space<vmem>>, %arg6: memref<32x164xf32, #tpu.memory_space<vmem>>) attributes {dimension_semantics = [#tpu.dimension_semantics<parallel>, #tpu.dimension_semantics<parallel>, #tpu.dimension_semantics<arbitrary>], iteration_bounds = array<i64: 1, 1, 1>, scalar_prefetch = 0 : i64, scratch_operands = 1 : i64, tpu.core_type = #tpu.core_type<tc>, window_params = [{transform_indices = @transform_0, window_bounds = array<i64: 32, 32>}, {transform_indices = @transform_1, window_bounds = array<i64: 32, 164>}, {transform_indices = @transform_2, window_bounds = array<i64: 32, 164>}]} {
    %c0_i32 = arith.constant 0 : i32
    %0 = arith.cmpi eq, %arg2, %c0_i32 : i32
    %1 = arith.extui %0 : i1 to i32
    %c0_i32_0 = arith.constant 0 : i32
    %2 = arith.cmpi ne, %1, %c0_i32_0 : i32
    scf.if %2 {
      %cst_10 = arith.constant 0.000000e+00 : f32
      %13 = vector.broadcast %cst_10 : f32 to vector<32x164xf32>
      %c0_11 = arith.constant 0 : index
      %c0_12 = arith.constant 0 : index
      %14 = vector.load %arg6[%c0_11, %c0_12] : memref<32x164xf32, #tpu.memory_space<vmem>>, vector<32x164xf32>
      tpu.vector_store %arg6[%c0_11, %c0_12], %13 {strides = array<i32>} : memref<32x164xf32, #tpu.memory_space<vmem>>, vector<32x164xf32>,
    } else {
    }
    %c0 = arith.constant 0 : index
    %c0_1 = arith.constant 0 : index
    %3 = vector.load %arg6[%c0, %c0_1] : memref<32x164xf32, #tpu.memory_space<vmem>>, vector<32x164xf32>
    %c0_2 = arith.constant 0 : index
    %c0_3 = arith.constant 0 : index
    %4 = vector.load %arg3[%c0_2, %c0_3] : memref<32x32xf32, #tpu.memory_space<vmem>>, vector<32x32xf32>
    %5 = arith.truncf %4 : vector<32x32xf32> to vector<32x32xbf16>
    %c0_4 = arith.constant 0 : index
    %c0_5 = arith.constant 0 : index
    %6 = vector.load %arg4[%c0_4, %c0_5] : memref<32x164xbf16, #tpu.memory_space<vmem>>, vector<32x164xbf16>
    %cst = arith.constant dense<0.000000e+00> : vector<32x164xf32>
    %7 = tpu.matmul %5, %6, %cst {dimension_numbers = #tpu.dot_dimension_numbers<[1], [0], [0], [1], [0, 0, 1, 1], [], []>} : vector<32x32xbf16>, vector<32x164xbf16>, vector<32x164xf32> -> vector<32x164xf32>
    %8 = arith.addf %3, %7 : vector<32x164xf32>
    %c0_6 = arith.constant 0 : index
    %c0_7 = arith.constant 0 : index
    %9 = vector.load %arg6[%c0_6, %c0_7] : memref<32x164xf32, #tpu.memory_space<vmem>>, vector<32x164xf32>
    tpu.vector_store %arg6[%c0_6, %c0_7], %8 {strides = array<i32>} : memref<32x164xf32, #tpu.memory_space<vmem>>, vector<32x164xf32>,
    %c0_i32_8 = arith.constant 0 : i32
    %10 = arith.cmpi eq, %arg2, %c0_i32_8 : i32
    %11 = arith.extui %10 : i1 to i32
    %c0_i32_9 = arith.constant 0 : i32
    %12 = arith.cmpi ne, %11, %c0_i32_9 : i32
    scf.if %12 {
      %c0_10 = arith.constant 0 : index
      %c0_11 = arith.constant 0 : index
      %13 = vector.load %arg6[%c0_10, %c0_11] : memref<32x164xf32, #tpu.memory_space<vmem>>, vector<32x164xf32>
      %14 = arith.truncf %13 : vector<32x164xf32> to vector<32x164xbf16>
      %c0_12 = arith.constant 0 : index
      %c0_13 = arith.constant 0 : index
      %15 = vector.load %arg5[%c0_12, %c0_13] : memref<32x164xbf16, #tpu.memory_space<vmem>>, vector<32x164xbf16>
      tpu.vector_store %arg5[%c0_12, %c0_13], %14 {strides = array<i32>} : memref<32x164xbf16, #tpu.memory_space<vmem>>, vector<32x164xbf16>,
    } else {
    }
    return
  }
  func.func @transform_0(%arg0: i32, %arg1: i32, %arg2: i32) -> (i32, i32) {
    %c0_i32 = arith.constant 0 : i32
    return %arg0, %arg2 : i32, i32
  }
  func.func @transform_1(%arg0: i32, %arg1: i32, %arg2: i32) -> (i32, i32) {
    %c0_i32 = arith.constant 0 : i32
    return %arg2, %arg1 : i32, i32
  }
  func.func @transform_2(%arg0: i32, %arg1: i32, %arg2: i32) -> (i32, i32) {
    %c0_i32 = arith.constant 0 : i32
    return %arg0, %arg1 : i32, i32
  }
}

</mosaic_0001>

<bundles_post_ra>
// kernel: tpu_custom_call.1
= control target key start
LH: loop header
LB: loop body
LE: loop exit
PB: predicated region body
PF: predicated region fallthrough
CT: control target
= control target key end

     0   :  { %7 = vsyncpa [#allocation4], 0  ;;  %s407_s0 = inlined_call_operand.hbm [shape: f32[32,32], index: 0, kind: input, shape index: {}]   ;;  %s408_s1 = inlined_call_operand.hbm [shape: bf16[32,164], index: 1, kind: input, shape index: {}]   ;;  %s409_s2 = inlined_call_operand.hbm [shape: bf16[32,164], index: 2, kind: output, shape index: {}]  }
   0x1   :  { %8 = vsyncpa [#allocation7], 0 }
   0x2   :  { %9 = vsyncpa [#allocation5], 0  ;;  %s332_s9 = smov [#allocation3]   ;;  %s260_s13 = scalar_lea.hbm %s407_s0, 512 }
   0x3   :  { %s15_s10 = sshll.u32 %s332_s9, 4  ;;  %p261_p0 = scmp.ne.s32.totalorder %s407_s0, %s260_s13  ;;  %s16_s10 = int_to_ptr.vmem [resolvable:$true] %s15_s10 }
   0x4   :  { %p264_p1 = scmp.lt.u32.totalorder %s260_s13, %s407_s0 }
   0x6   :  { %p266_p2 = pnand %p264_p1, %p261_p0 }
   0x8   :  { %269 = shalt.err (!%p266_p2)
}
   0x9   :  { %s270_s18 = scalar_lea.vmem %s16_s10, 512  ;;  %p275_p4 = scmp.lt.s32.totalorder %s16_s10, %s16_s10 }
   0xa   :  { %p271_p3 = scmp.ne.s32.totalorder %s16_s10, %s270_s18  ;;  %p276_p5 = scmp.lt.s32.totalorder %s270_s18, %s270_s18 }
   0xc   :  { %p277_p6 = por %p276_p5, %p275_p4 }
   0xe   :  { %p278_p7 = pnand %p277_p6, %p271_p3 }
  0x10   :  { %281 = shalt.err (!%p278_p7)
}
  0x11   :  { %s333_s19 = smov 128   ;;  %s334_s20 = smov 8  }
  0x12   :  { %21 = dma.hbm_to_vmem [thread:$0]  %s407_s0, 512, %s16_s10, [#allocation4], %s333_s19, %s333_s19, %s334_s20  }
  0x13   :  { %s335_s23 = smov [#allocation6]   ;;  %s282_s27 = scalar_lea.hbm %s408_s1, 512 }
  0x14   :  { %s27_s24 = sshll.u32 %s335_s23, 4  ;;  %p283_p8 = scmp.ne.s32.totalorder %s408_s1, %s282_s27  ;;  %s28_s24 = int_to_ptr.vmem [resolvable:$true] %s27_s24 }
  0x15   :  { %p286_p9 = scmp.lt.u32.totalorder %s282_s27, %s408_s1 }
  0x17   :  { %p288_p10 = pnand %p286_p9, %p283_p8 }
  0x19   :  { %291 = shalt.err (!%p288_p10)
}
  0x1a   :  { %s292_s4 = scalar_lea.vmem %s28_s24, 512  ;;  %p297_p12 = scmp.lt.s32.totalorder %s28_s24, %s28_s24 }
  0x1b   :  { %p293_p11 = scmp.ne.s32.totalorder %s28_s24, %s292_s4  ;;  %p298_p13 = scmp.lt.s32.totalorder %s292_s4, %s292_s4 }
  0x1d   :  { %p299_p0 = por %p298_p13, %p297_p12 }
  0x1f   :  { %p300_p1 = pnand %p299_p0, %p293_p11 }
  0x21   :  { %303 = shalt.err (!%p300_p1)
}
  0x22   :  { %33 = dma.hbm_to_vmem [thread:$0]  %s408_s1, 512, %s28_s24, [#allocation7], %s333_s19, %s333_s19, %s334_s20  }
  0x23   :  { %326 = dma.done.wait [#allocation4], 512  }
  0x24   :  { %327 = vsyncadd [#allocation4], 4294966784 }
  0x25   :  { %328 = dma.done.wait [#allocation7], 512  }
  0x26   :  { %329 = vsyncadd [#allocation7], 4294966784  ;;  %v336_v0 = vmov 0   ;;  %v254_v1 = vld [vmem:[#allocation6 + $0x4] ss:$8 sps:$4 sm:$0xff]   ;;  %v64_v7 = vld [vmem:[#allocation3 + $0x10] sm:$0xff] }
  0x27   :  { %131 = vmatprep.mubr.bf16.mxu0 %v336_v0  ;;  %141 = vmatprep.mubr.bf16.mxu1 %v336_v0  ;;  %v256_v2 = vld [vmem:[#allocation6] ss:$8 sps:$4 sm:$0xff]   ;;  %v257_v3 = vld [vmem:[#allocation6 + $0x14] ss:$8 sps:$4 sm:$0xff]   ;;  %v259_v4 = vld [vmem:[#allocation6 + $0x10] ss:$8 sps:$4 sm:$0xff]  }
  0x28   :  { %99 = vmatprep.subr.bf16.mxu0 %v254_v1  ;;  %243 = vmatprep.subr.bf16.mxu1 %v254_v1  ;;  %v62_v5 = vld [vmem:[#allocation3] sm:$0xff]  ;;  %v63_v6 = vld [vmem:[#allocation3 + $0x8] sm:$0xff]  ;;  %v65_v8 = vld [vmem:[#allocation3 + $0x18] sm:$0xff]  ;;  %vm92_vm0 = vcmask 261120   ;;  %vm46_vm1 = vcmask 293888   ;;  %v337_v11 = vmov 0.0  }
  0x29   :  { %100 = vmatpush1.bf16.msra.mxu0 %v256_v2  ;;  %245 = vmatpush1.bf16.msra.mxu1 %v256_v2  ;;  %v66_v9 = vpack.c.bf16 %v63_v6, %v62_v5  ;;  %v67_v10 = vpack.c.bf16 %v65_v8, %v64_v7  ;;  %47 = vst.msk [vmem:[#allocation2 + $0x8] sm:$0xff] %vm46_vm1, %v337_v11  ;;  %49 = vst.msk [vmem:[#allocation2 + $0x18] sm:$0xff] %vm46_vm1, %v337_v11  ;;  %vm204_vm2 = vcmask 1043456   ;;  %vm205_vm3 = vcmask 293892   ;;  %s338_s1 = smov [#allocation8]  }
  0x2a   :  { %101 = vmatprep.subr.bf16.mxu0 %v257_v3  ;;  %244 = vmatprep.subr.bf16.mxu1 %v257_v3  ;;  %51 = vst.msk [vmem:[#allocation2 + $0x28] sm:$0xff] %vm46_vm1, %v337_v11  ;;  %53 = vst.msk [vmem:[#allocation2 + $0x38] sm:$0xff] %vm46_vm1, %v337_v11  ;;  %s216_s6 = sshll.u32 %s338_s1, 4  ;;  %s217_s6 = int_to_ptr.vmem [resolvable:$true] %s216_s6 }
  0x2b   :  { %vm206_vm4 = vmor %vm205_vm3, %vm204_vm2  ;;  %s304_s7 = scalar_lea.vmem %s217_s6, 512  ;;  %p309_p3 = scmp.lt.s32.totalorder %s217_s6, %s217_s6 }
  0x2c   :  { %p305_p2 = scmp.ne.s32.totalorder %s217_s6, %s304_s7  ;;  %p310_p4 = scmp.lt.s32.totalorder %s304_s7, %s304_s7 }
  0x2d   :  { %102 = vmatpush1.bf16.msra.mxu0 %v259_v4  ;;  %246 = vmatpush1.bf16.msra.mxu1 %v259_v4 }
  0x2e   :  { %p311_p5 = por %p310_p4, %p309_p3 }
  0x30   :  { %233 = vmatmul.mubr.msk.bf16.vlgmr.msra.gmra.mrb[0].mxu0 %vm92_vm0, %v66_v9  ;;  %234 = vmatmul.mubr.msk.bf16.vlgmr.msra.gmra.mrb[0].mxu1 %vm92_vm0, %v67_v10  ;;  %v55_v12 = vld [vmem:[#allocation2 + $0x8] sm:$0xff]  ;;  %v57_v18 = vld [vmem:[#allocation2 + $0x18] sm:$0xff]  ;;  %p312_p6 = pnand %p311_p5, %p305_p2 }
  0x31   :  { %v59_v13 = vld [vmem:[#allocation2 + $0x28] sm:$0xff]  ;;  %v61_v19 = vld [vmem:[#allocation2 + $0x38] sm:$0xff] }
 0x103   :  { %v133_v14 = vpop.f32.mrb[0].mxu0  ;;  %v143_v15 = vpop.f32.mrb[0].mxu1 }
 0x104   :  { %v135_v16 = vpop.f32.mrb[1].mxu0  ;;  %v145_v17 = vpop.f32.mrb[1].mxu1 }
 0x105   :  { %v153_v20 = vadd.f32 %v135_v16, %v55_v12  ;;  %v157_v21 = vadd.f32 %v145_v17, %v59_v13  ;;  %v137_v22 = vpop.f32.mrb[2].mxu0  ;;  %v147_v23 = vpop.f32.mrb[2].mxu1 }
 0x106   :  { %v139_v24 = vpop.f32.mrb[3].mxu0  ;;  %v149_v25 = vpop.f32.mrb[3].mxu1 }
 0x107   :  { %162 = vst.msk [vmem:[#allocation2 + $0x8] sm:$0xff] %vm46_vm1, %v153_v20  ;;  %166 = vst.msk [vmem:[#allocation2 + $0x28] sm:$0xff] %vm46_vm1, %v157_v21  ;;  %v155_v26 = vadd.f32 %v139_v24, %v57_v18  ;;  %v159_v27 = vadd.f32 %v149_v25, %v61_v19 }
 0x109   :  { %164 = vst.msk [vmem:[#allocation2 + $0x18] sm:$0xff] %vm46_vm1, %v155_v26  ;;  %168 = vst.msk [vmem:[#allocation2 + $0x38] sm:$0xff] %vm46_vm1, %v159_v27 }
 0x10e   :  { %v173_v28 = vld [vmem:[#allocation2 + $0x8] sm:$0xff] }
 0x10f   :  { %v177_v29 = vld [vmem:[#allocation2 + $0x28] sm:$0xff]  ;;  %v239_v30 = vpack.c.bf16 %v173_v28, %v133_v14 }
 0x110   :  { %v241_v31 = vpack.c.bf16 %v177_v29, %v143_v15  ;;  %v175_v32 = vld [vmem:[#allocation2 + $0x18] sm:$0xff] }
 0x111   :  { %v179_v33 = vld [vmem:[#allocation2 + $0x38] sm:$0xff]  ;;  %v240_v34 = vpack.c.bf16 %v175_v32, %v137_v22  ;;  %207 = vst.msk [vmem:[#allocation8] sm:$0xff] %vm206_vm4, %v239_v30 }
 0x112   :  { %v242_v35 = vpack.c.bf16 %v179_v33, %v147_v23  ;;  %209 = vst.msk [vmem:[#allocation8 + $0x10] sm:$0xff] %vm206_vm4, %v241_v31 }
 0x113   :  { %208 = vst.msk [vmem:[#allocation8 + $0x8] sm:$0xff] %vm206_vm4, %v240_v34 }
 0x114   :  { %210 = vst.msk [vmem:[#allocation8 + $0x18] sm:$0xff] %vm206_vm4, %v242_v35 }
 0x115   :  { %315 = shalt.err (!%p312_p6)
}
 0x116   :  { %s316_s10 = scalar_lea.hbm %s409_s2, 512 }
 0x117   :  { %p317_p7 = scmp.ne.s32.totalorder %s409_s2, %s316_s10  ;;  %p320_p8 = scmp.lt.u32.totalorder %s316_s10, %s409_s2 }
 0x119   :  { %p322_p9 = pnand %p320_p8, %p317_p7 }
 0x11b   :  { %325 = shalt.err (!%p322_p9)
}
 0x11c   :  { %222 = dma.vmem_to_hbm [thread:$0]  %s217_s6, 512, %s409_s2, [#allocation5], %s333_s19, %s333_s19, %s334_s20  }
 0x11d   :  { %330 = dma.done.wait [#allocation5], 512  }
 0x11e   :  { %331 = vsyncadd [#allocation5], 4294966784 }
 0x11f   :  { %226 = vsyncpa [#allocation4], 1 }
 0x120   :  { %227 = vsyncpa [#allocation7], 1 }
 0x121   :  { %228 = vsyncpa [#allocation5], 1 }

</bundles_post_ra>
